<compile_context>
chip_gen: v5e
topology: v5e:2x2
jax: 0.10.0
libtpu: 0.0.40
codegen_flags: <defaults>
</compile_context>

<pallas_src>
import math
import functools

import jax
import jax.numpy as jnp
from jax.experimental import pallas as pl
from jax.experimental.pallas import tpu as pltpu


def _round_up(a, b):
    return (a + b - 1) // b * b


def make_positional_encoding(d_model, max_len, dtype=jnp.float32):
    """Deterministically build the `pe` buffer exactly like the module __init__."""
    position = jnp.arange(max_len, dtype=jnp.float32)[:, None]                  # (L, 1)
    div_term = jnp.exp(jnp.arange(0, d_model, 2, dtype=jnp.float32)
                       * (-math.log(10000.0) / d_model))                        # (D/2,)
    angles = position * div_term                                                # (L, D/2)
    pe = jnp.zeros((max_len, 1, d_model), jnp.float32)
    pe = pe.at[:, 0, 0::2].set(jnp.sin(angles))
    pe = pe.at[:, 0, 1::2].set(jnp.cos(angles))
    return pe.astype(dtype)


def _pe_add_kernel(x_ref, pe_ref, o_ref):
    """Eval-mode tile: broadcast-add of pe over the batch axis."""
    pe_t = pe_ref[...].astype(x_ref.dtype)                  # single cast per tile
    o_ref[...] = x_ref[...] + jnp.broadcast_to(pe_t, x_ref.shape)


def _pe_add_dropout_kernel(x_ref, pe_ref, bits_ref, o_ref, *, dropout_p, keep_threshold):
    """Train-mode tile: pe add + inverted dropout from a streamed uint32 bit tile."""
    pe_t = pe_ref[...].astype(x_ref.dtype)
    y = x_ref[...] + jnp.broadcast_to(pe_t, x_ref.shape)
    # Integer-domain keep test: P(keep) = 1 - p.  No float conversion needed.
    keep = bits_ref[...] >= jnp.uint32(keep_threshold)
    scale = jnp.asarray(1.0 / (1.0 - dropout_p), dtype=y.dtype)
    o_ref[...] = jnp.where(keep, y * scale, jnp.zeros_like(y))


def _pick_seq_tile(S, B, D, itemsize, n_streams):
    """Largest sequence tile keeping all double-buffered streams well under VMEM."""
    # bytes of one sequence row of a tile once the trailing (B, D) face is
    # padded to the (8, 128) VMEM tiling.
    row_bytes = _round_up(B, 8) * _round_up(D, 128) * itemsize
    # ~12 MiB total across streams, each double-buffered (v7x-safe headroom).
    budget = (12 * 1024 * 1024) // max(2 * n_streams, 1)
    ts = max(8, budget // max(row_bytes, 1))
    if ts >= S:
        return S
    return max(8, (ts // 8) * 8)


def positional_encoding_forward(x, pe, *, dropout_p=0.0, training=False, key=None,
                                seq_tile=None):
    """x: (S, B, D);  pe: (max_len, 1, D) with max_len >= S."""
    S, B, D = x.shape
    max_len = pe.shape[0]
    assert max_len >= S, "max_len must be >= seq_len"
    assert pe.shape[2] == D

    use_dropout = bool(training) and float(dropout_p) > 0.0
    n_streams = 4 if use_dropout else 3        # x(+bits) in + out

    if seq_tile is None:
        TS = _pick_seq_tile(S, B, D, x.dtype.itemsize, n_streams)
    else:
        TS = min(int(seq_tile), S)
    grid = (pl.cdiv(S, TS),)

    x_spec = pl.BlockSpec((TS, B, D), lambda i: (i, 0, 0))
    pe_spec = pl.BlockSpec((TS, 1, D), lambda i: (i, 0, 0))
    out_spec = pl.BlockSpec((TS, B, D), lambda i: (i, 0, 0))
    cparams = pltpu.CompilerParams(dimension_semantics=("parallel",))
    out_shape = jax.ShapeDtypeStruct((S, B, D), x.dtype)

    # TODO(synk): with d_model=32 the output's last dim only fills 32 of 128
    # lanes; merging batch into the lane axis would need a wrapper-side layout
    # transpose that costs more HBM traffic than it saves for this mem-bound
    # elementwise op, so the 3D broadcast layout is kept.

    if not use_dropout:
        return pl.pallas_call(
            _pe_add_kernel,
            out_shape=out_shape,
            grid=grid,
            in_specs=[x_spec, pe_spec],
            out_specs=out_spec,
            compiler_params=cparams,
        )(x, pe)

    if key is None:
        key = jax.random.PRNGKey(0)
    # Portable dropout bits (uint32), streamed into the kernel tile-by-tile.
    bits = jax.random.bits(key, shape=(S, B, D), dtype=jnp.uint32)
    keep_threshold = min(max(int(round(float(dropout_p) * (1 << 32))), 0), (1 << 32) - 1)

    kernel = functools.partial(_pe_add_dropout_kernel,
                               dropout_p=float(dropout_p),
                               keep_threshold=keep_threshold)
    bits_spec = pl.BlockSpec((TS, B, D), lambda i: (i, 0, 0))

    return pl.pallas_call(
        kernel,
        out_shape=out_shape,
        grid=grid,
        in_specs=[x_spec, pe_spec, bits_spec],
        out_specs=out_spec,
        compiler_params=cparams,
    )(x, pe, bits)


if __name__ == "__main__":
    # Small shapes consistent with the module: d_model=32, dropout 0.1.
    d_model, dropout_p, max_len = 32, 0.1, 128
    batch = 2

    pe = make_positional_encoding(d_model, max_len)

    # --- seq=8: single-tile eval-mode forward, checked against the reference ---
    seq_len = 8
    x = jax.random.normal(jax.random.PRNGKey(0), (seq_len, batch, d_model),
                          dtype=jnp.float32)
    y_eval = positional_encoding_forward(x, pe, dropout_p=dropout_p, training=False)
    y_eval = jax.block_until_ready(y_eval)
    ref = x + pe[:seq_len]
    assert y_eval.shape == (seq_len, batch, d_model)
    assert jnp.allclose(y_eval, ref, atol=1e-6, rtol=1e-6)

    # --- seq=128 with seq_tile=32: exercises the tiled / pipelined grid path ---
    seq_long = 128
    x_long = jax.random.normal(jax.random.PRNGKey(1), (seq_long, batch, d_model),
                               dtype=jnp.float32)
    y_long = positional_encoding_forward(x_long, pe, dropout_p=dropout_p,
                                         training=False, seq_tile=32)
    y_long = jax.block_until_ready(y_long)
    ref_long = x_long + pe[:seq_long]
    assert jnp.allclose(y_long, ref_long, atol=1e-6, rtol=1e-6)

    # --- train mode: fused pe-add + inverted dropout across 4 sequence tiles ---
    y_train = positional_encoding_forward(x_long, pe, dropout_p=dropout_p,
                                          training=True,
                                          key=jax.random.PRNGKey(123), seq_tile=32)
    y_train = jax.block_until_ready(y_train)
    assert y_train.shape == (seq_long, batch, d_model)
    # Every element is either exactly dropped (0) or scaled by 1/(1-p).
    dropped = jnp.isclose(y_train, 0.0)
    kept_ok = jnp.isclose(y_train, ref_long / (1.0 - dropout_p), atol=1e-5, rtol=1e-5)
    assert bool(jnp.all(dropped | kept_ok))
    frac_dropped = float(jnp.mean(dropped.astype(jnp.float32)))
    assert 0.02 < frac_dropped < 0.25, frac_dropped

    print("KERNEL_OK")
</pallas_src>

<mosaic_0001>
module attributes {stable_mosaic.version = 11 : i64} {
  func.func @_pe_add_kernel(%arg0: i32, %arg1: memref<8x2x32xf32, #tpu.memory_space<vmem>>, %arg2: memref<8x1x32xf32, #tpu.memory_space<vmem>>, %arg3: memref<8x2x32xf32, #tpu.memory_space<vmem>>) attributes {dimension_semantics = [#tpu.dimension_semantics<parallel>], iteration_bounds = array<i64: 1>, scalar_prefetch = 0 : i64, scratch_operands = 0 : i64, tpu.core_type = #tpu.core_type<tc>, window_params = [{transform_indices = @transform_0, window_bounds = array<i64: 8, 2, 32>}, {transform_indices = @transform_1, window_bounds = array<i64: 8, 1, 32>}, {transform_indices = @transform_2, window_bounds = array<i64: 8, 2, 32>}]} {
    %c0 = arith.constant 0 : index
    %c0_0 = arith.constant 0 : index
    %c0_1 = arith.constant 0 : index
    %0 = vector.load %arg2[%c0, %c0_0, %c0_1] : memref<8x1x32xf32, #tpu.memory_space<vmem>>, vector<8x1x32xf32>
    %c0_2 = arith.constant 0 : index
    %c0_3 = arith.constant 0 : index
    %c0_4 = arith.constant 0 : index
    %1 = vector.load %arg1[%c0_2, %c0_3, %c0_4] : memref<8x2x32xf32, #tpu.memory_space<vmem>>, vector<8x2x32xf32>
    %2 = vector.shape_cast %0 : vector<8x1x32xf32> to vector<8x1x32xf32>
    %3 = vector.broadcast %2 : vector<8x1x32xf32> to vector<8x2x32xf32>
    %4 = arith.addf %1, %3 : vector<8x2x32xf32>
    %c0_5 = arith.constant 0 : index
    %c0_6 = arith.constant 0 : index
    %c0_7 = arith.constant 0 : index
    %5 = vector.load %arg3[%c0_5, %c0_6, %c0_7] : memref<8x2x32xf32, #tpu.memory_space<vmem>>, vector<8x2x32xf32>
    tpu.vector_store %arg3[%c0_5, %c0_6, %c0_7], %4 {strides = array<i32>} : memref<8x2x32xf32, #tpu.memory_space<vmem>>, vector<8x2x32xf32>,
    return
  }
  func.func @transform_0(%arg0: i32) -> (i32, i32, i32) {
    %c0_i32 = arith.constant 0 : i32
    %c0_i32_0 = arith.constant 0 : i32
    %c0_i32_1 = arith.constant 0 : i32
    return %arg0, %c0_i32, %c0_i32_0 : i32, i32, i32
  }
  func.func @transform_1(%arg0: i32) -> (i32, i32, i32) {
    %c0_i32 = arith.constant 0 : i32
    %c0_i32_0 = arith.constant 0 : i32
    %c0_i32_1 = arith.constant 0 : i32
    return %arg0, %c0_i32, %c0_i32_0 : i32, i32, i32
  }
  func.func @transform_2(%arg0: i32) -> (i32, i32, i32) {
    %c0_i32 = arith.constant 0 : i32
    %c0_i32_0 = arith.constant 0 : i32
    %c0_i32_1 = arith.constant 0 : i32
    return %arg0, %c0_i32, %c0_i32_0 : i32, i32, i32
  }
}

</mosaic_0001>

<bundles_post_ra>
// kernel: tpu_custom_call.1
= control target key start
LH: loop header
LB: loop body
LE: loop exit
PB: predicated region body
PF: predicated region fallthrough
CT: control target
= control target key end

     0   :  { %vm60_vm0 = vcmask 254976   ;;  %s201_s0 = inlined_call_operand.vmem [shape: f32[8,2,32], index: 0, kind: input, shape index: {}]   ;;  %s202_s1 = inlined_call_operand.vmem [shape: f32[128,1,32], index: 1, kind: input, shape index: {}]   ;;  %s203_s2 = inlined_call_operand.hbm [shape: f32[8,2,32], index: 2, kind: output, shape index: {}]  }
   0x1   :  { %v20_v0 = vld [vmem:[%s201_s0] sm:$0x3]  ;;  %v21_v2 = vld [vmem:[%s201_s0 + $0x2] sm:$0x3]  ;;  %v22_v5 = vld [vmem:[%s201_s0 + $0x4] sm:$0x3] }
   0x2   :  { %v90_v1 = vld [vmem:[%s202_s1] ss:$0 sm:$0xff]  ;;  %v91_v4 = vld [vmem:[%s202_s1 + $0x1] ss:$0 sm:$0xff]  ;;  %v92_v6 = vld [vmem:[%s202_s1 + $0x2] ss:$0 sm:$0xff] }
   0x3   :  { %v52_v3 = vadd.f32 %v90_v1, %v20_v0  ;;  %v23_v7 = vld [vmem:[%s201_s0 + $0x6] sm:$0x3]  ;;  %v53_v8 = vadd.f32 %v91_v4, %v21_v2  ;;  %v93_v9 = vld [vmem:[%s202_s1 + $0x3] ss:$0 sm:$0xff]  ;;  %v54_v10 = vadd.f32 %v92_v6, %v22_v5  ;;  %v24_v11 = vld [vmem:[%s201_s0 + $0x8] sm:$0x3] }
   0x4   :  { %v94_v12 = vld [vmem:[%s202_s1 + $0x4] ss:$0 sm:$0xff]  ;;  %v55_v13 = vadd.f32 %v93_v9, %v23_v7  ;;  %v25_v14 = vld [vmem:[%s201_s0 + $0xa] sm:$0x3]  ;;  %v95_v15 = vld [vmem:[%s202_s1 + $0x5] ss:$0 sm:$0xff] }
   0x5   :  { %61 = vst.msk [vmem:[#allocation2] sm:$0x3] %vm60_vm0, %v52_v3  ;;  %v56_v16 = vadd.f32 %v94_v12, %v24_v11  ;;  %v26_v17 = vld [vmem:[%s201_s0 + $0xc] sm:$0x3]  ;;  %v57_v18 = vadd.f32 %v95_v15, %v25_v14  ;;  %v96_v19 = vld [vmem:[%s202_s1 + $0x6] ss:$0 sm:$0xff] }
   0x6   :  { %62 = vst.msk [vmem:[#allocation2 + $0x2] sm:$0x3] %vm60_vm0, %v53_v8  ;;  %v27_v20 = vld [vmem:[%s201_s0 + $0xe] sm:$0x3]  ;;  %v97_v21 = vld [vmem:[%s202_s1 + $0x7] ss:$0 sm:$0xff]  ;;  %v58_v22 = vadd.f32 %v96_v19, %v26_v17 }
   0x7   :  { %63 = vst.msk [vmem:[#allocation2 + $0x4] sm:$0x3] %vm60_vm0, %v54_v10 }
   0x8   :  { %64 = vst.msk [vmem:[#allocation2 + $0x6] sm:$0x3] %vm60_vm0, %v55_v13 }
   0x9   :  { %65 = vst.msk [vmem:[#allocation2 + $0x8] sm:$0x3] %vm60_vm0, %v56_v16 }
   0xa   :  { %66 = vst.msk [vmem:[#allocation2 + $0xa] sm:$0x3] %vm60_vm0, %v57_v18 }
   0xb   :  { %7 = vsyncpa [#allocation3], 0  ;;  %s124_s13 = smov [#allocation2]   ;;  %s75_s17 = sshll.u32 %s203_s2, 4  ;;  %v59_v23 = vadd.f32 %v97_v21, %v27_v20  ;;  %67 = vst.msk [vmem:[#allocation2 + $0xc] sm:$0x3] %vm60_vm0, %v58_v22  ;;  %s76_s17 = int_to_ptr.hbm [resolvable:$true] %s75_s17 }
   0xc   :  { %s73_s14 = sshll.u32 %s124_s13, 4  ;;  %s125_s0 = smov 32   ;;  %s74_s14 = int_to_ptr.vmem [resolvable:$true] %s73_s14 }
   0xd   :  { %68 = vst.msk [vmem:[#allocation2 + $0xe] sm:$0x3] %vm60_vm0, %v59_v23  ;;  %s126_s18 = smov 2  }
   0xe   :  { %81 = dma.vmem_to_hbm [thread:$0]  %s74_s14, 256, %s76_s17, [#allocation3], %s125_s0, %s125_s0, %s126_s18  }
   0xf   :  { %122 = dma.done.wait [#allocation3], 256  }
  0x10   :  { %123 = vsyncadd [#allocation3], 4294967040 }
  0x11   :  { %86 = vsyncpa [#allocation3], 1 }

</bundles_post_ra>
